<compile_context>
chip_gen: v7x
topology: tpu7x:2x2x1
jax: 0.10.0
libtpu: 0.0.40
codegen_flags: <defaults>
</compile_context>

<pallas_src>
import jax
import jax.numpy as jnp
from jax.experimental import pallas as pl
from jax.experimental.pallas import tpu as pltpu

LANE = 128


def _round_up(n, m):
    return ((n + m - 1) // m) * m


def qnetwork_kernel(x_ref, w1_ref, b1_ref, w2_ref, b2_ref, w3_ref, b3_ref, out_ref):
    """relu(x@W1+b1) -> relu(.@W2+b2) -> .@W3+b3.

    Layers 1-2: bf16 MXU matmuls, f32 accumulate, f32 bias+ReLU epilogue.
    Layer 3: f32 matmul (tiny) so final Q-values are not perturbed by bf16.
    """
    x = x_ref[...].astype(jnp.bfloat16)

    h1 = jnp.dot(x, w1_ref[...], preferred_element_type=jnp.float32) + b1_ref[...]
    h1 = jnp.maximum(h1, 0.0).astype(jnp.bfloat16)

    h2 = jnp.dot(h1, w2_ref[...], preferred_element_type=jnp.float32) + b2_ref[...]
    h2 = jnp.maximum(h2, 0.0)  # stays f32 into the final layer

    y = jnp.dot(h2, w3_ref[...], preferred_element_type=jnp.float32) + b3_ref[...]
    out_ref[...] = y.astype(out_ref.dtype)


def prepare_params(params):
    """One-time padding / casting of QNetwork parameters for the kernel.

    Hidden widths are zero-padded to a multiple of 128 (lane-dense and exact:
    padded hidden units are relu(0+0)=0 and multiply zero weight rows
    downstream).  W1/W2 are cast to bf16 (MXU-native); biases and the tiny
    final layer stay f32.  Call once; do NOT call per forward pass.
    """
    w1, b1, w2, b2, w3, b3 = params
    S, H1 = w1.shape
    H2, A = w2.shape[1], w3.shape[1]
    H1p, H2p = _round_up(H1, LANE), _round_up(H2, LANE)

    def pad2(a, rows, cols):
        return jnp.pad(a, ((0, rows - a.shape[0]), (0, cols - a.shape[1])))

    w1p = pad2(w1, S, H1p).astype(jnp.bfloat16)
    w2p = pad2(w2, H1p, H2p).astype(jnp.bfloat16)
    w3p = pad2(w3, H2p, A).astype(jnp.float32)          # output dim left unpadded
    b1p = pad2(b1.reshape(1, -1), 1, H1p).astype(jnp.float32)
    b2p = pad2(b2.reshape(1, -1), 1, H2p).astype(jnp.float32)
    b3p = b3.reshape(1, -1).astype(jnp.float32)
    return (w1p, b1p, w2p, b2p, w3p, b3p)


def _tile_plan(batch, tile_b):
    """Pick (tile, padded_batch): minimal batch padding; >=2 grid steps for
    big batches so both v7x TensorCores get work (harmless on v5e/v6e)."""
    b8 = _round_up(max(batch, 1), 8)
    n_tiles = pl.cdiv(b8, tile_b)
    if n_tiles == 1 and b8 >= 512:
        n_tiles = 2
    tb = _round_up(pl.cdiv(b8, n_tiles), 8)
    return tb, tb * n_tiles


def qnetwork_forward(x, prepared_params, *, tile_b=4096):
    """x: [B, state_size] float32 -> Q-values [B, action_size] float32."""
    w1p, b1p, w2p, b2p, w3p, b3p = prepared_params
    B, S = x.shape
    assert S == w1p.shape[0], "state_size mismatch with prepared params"
    A = w3p.shape[1]

    tb, Bp = _tile_plan(B, tile_b)
    xp = x if Bp == B else jnp.pad(x, ((0, Bp - B), (0, 0)))
    grid = (Bp // tb,)

    # Weights/biases stay VMEM-resident (constant index_map); x / out stream.
    resident = lambda a: pl.BlockSpec(a.shape, lambda i: (0, 0))

    flops = 2 * Bp * (S * w1p.shape[1] + w2p.shape[0] * w2p.shape[1] + w3p.shape[0] * A)
    bytes_accessed = (
        xp.size * 4
        + (w1p.size + w2p.size) * 2
        + (w3p.size + b1p.size + b2p.size + b3p.size) * 4
        + Bp * A * 4
    )

    out = pl.pallas_call(
        qnetwork_kernel,
        out_shape=jax.ShapeDtypeStruct((Bp, A), jnp.float32),
        grid_spec=pltpu.PrefetchScalarGridSpec(
            num_scalar_prefetch=0,
            grid=grid,
            in_specs=[
                pl.BlockSpec((tb, S), lambda i: (i, 0)),   # x: streamed over batch
                resident(w1p), resident(b1p),
                resident(w2p), resident(b2p),
                resident(w3p), resident(b3p),
            ],
            out_specs=pl.BlockSpec((tb, A), lambda i: (i, 0)),  # narrow, unpadded out
        ),
        compiler_params=pltpu.CompilerParams(
            dimension_semantics=("parallel",),     # shard batch across TCs on v7x
            vmem_limit_bytes=32 * 1024 * 1024,     # within v7x's 64 MiB physical
        ),
        cost_estimate=pl.CostEstimate(
            flops=flops, transcendentals=0, bytes_accessed=bytes_accessed),
    )(xp, w1p, b1p, w2p, b2p, w3p, b3p)

    return out[:B]


def init_params(key, state_size, action_size, hidden_layers_units=(64, 64)):
    """Deterministic init mimicking nn.Linear's default U(-1/sqrt(fan_in), 1/sqrt(fan_in))."""
    dims = [state_size, hidden_layers_units[0], hidden_layers_units[1], action_size]
    params = []
    for i in range(3):
        fan_in, fan_out = dims[i], dims[i + 1]
        key, kw, kb = jax.random.split(key, 3)
        bound = 1.0 / (fan_in ** 0.5)
        # Stored as [in, out] so the kernel computes x @ W.
        w = jax.random.uniform(kw, (fan_in, fan_out), jnp.float32, -bound, bound)
        b = jax.random.uniform(kb, (1, fan_out), jnp.float32, -bound, bound)
        params.extend([w, b])
    return tuple(params)


def reference_forward(x, params):
    """Plain-JAX f32 reference for sanity checking."""
    w1, b1, w2, b2, w3, b3 = params
    h1 = jnp.maximum(x @ w1 + b1, 0.0)
    h2 = jnp.maximum(h1 @ w2 + b2, 0.0)
    return h2 @ w3 + b3


if __name__ == "__main__":
    key = jax.random.PRNGKey(0)
    batch, state_size, action_size = 8, 8, 4

    key, kx, kp = jax.random.split(key, 3)
    x = jax.random.normal(kx, (batch, state_size), jnp.float32)
    params = init_params(kp, state_size, action_size)
    prep = prepare_params(params)          # one-time pad/cast (not per forward)

    fwd = jax.jit(qnetwork_forward)
    y = jax.block_until_ready(fwd(x, prep))

    y_ref = reference_forward(x, params)
    assert y.shape == (batch, action_size)
    # bf16 hidden layers (f32 accumulate) vs f32 reference -> loose-ish tolerance.
    assert jnp.allclose(y, y_ref, atol=5e-2, rtol=5e-2), "mismatch vs JAX reference"

    # Also exercise the multi-tile (pipelined, padded-batch) path at small size.
    key, kx2 = jax.random.split(key)
    x2 = jax.random.normal(kx2, (200, state_size), jnp.float32)
    y2 = jax.block_until_ready(qnetwork_forward(x2, prep, tile_b=64))
    y2_ref = reference_forward(x2, params)
    assert y2.shape == (200, action_size)
    assert jnp.allclose(y2, y2_ref, atol=5e-2, rtol=5e-2), "multi-tile mismatch"

    print("KERNEL_OK")
</pallas_src>

<mosaic_0001>
module attributes {stable_mosaic.version = 11 : i64} {
  func.func @qnetwork_kernel(%arg0: i32, %arg1: memref<8x8xf32, #tpu.memory_space<vmem>>, %arg2: memref<8x128xbf16, #tpu.memory_space<vmem>>, %arg3: memref<1x128xf32, #tpu.memory_space<vmem>>, %arg4: memref<128x128xbf16, #tpu.memory_space<vmem>>, %arg5: memref<1x128xf32, #tpu.memory_space<vmem>>, %arg6: memref<128x4xf32, #tpu.memory_space<vmem>>, %arg7: memref<1x4xf32, #tpu.memory_space<vmem>>, %arg8: memref<8x4xf32, #tpu.memory_space<vmem>>) attributes {dimension_semantics = [#tpu.dimension_semantics<parallel>], iteration_bounds = array<i64: 1>, scalar_prefetch = 0 : i64, scratch_operands = 0 : i64, tpu.core_type = #tpu.core_type<tc>, window_params = [{transform_indices = @transform_0, window_bounds = array<i64: 8, 8>}, {pipeline_mode = #tpu.pipeline_mode<synchronous>, transform_indices = @transform_1, window_bounds = array<i64: 8, 128>}, {pipeline_mode = #tpu.pipeline_mode<synchronous>, transform_indices = @transform_2, window_bounds = array<i64: 1, 128>}, {pipeline_mode = #tpu.pipeline_mode<synchronous>, transform_indices = @transform_3, window_bounds = array<i64: 128, 128>}, {pipeline_mode = #tpu.pipeline_mode<synchronous>, transform_indices = @transform_4, window_bounds = array<i64: 1, 128>}, {pipeline_mode = #tpu.pipeline_mode<synchronous>, transform_indices = @transform_5, window_bounds = array<i64: 128, 4>}, {pipeline_mode = #tpu.pipeline_mode<synchronous>, transform_indices = @transform_6, window_bounds = array<i64: 1, 4>}, {transform_indices = @transform_7, window_bounds = array<i64: 8, 4>}]} {
    %c0 = arith.constant 0 : index
    %c0_0 = arith.constant 0 : index
    %0 = vector.load %arg1[%c0, %c0_0] : memref<8x8xf32, #tpu.memory_space<vmem>>, vector<8x8xf32>
    %1 = arith.truncf %0 : vector<8x8xf32> to vector<8x8xbf16>
    %c0_1 = arith.constant 0 : index
    %c0_2 = arith.constant 0 : index
    %2 = vector.load %arg2[%c0_1, %c0_2] : memref<8x128xbf16, #tpu.memory_space<vmem>>, vector<8x128xbf16>
    %cst = arith.constant dense<0.000000e+00> : vector<8x128xf32>
    %3 = tpu.matmul %1, %2, %cst {dimension_numbers = #tpu.dot_dimension_numbers<[1], [0], [0], [1], [0, 0, 1, 1], [], []>} : vector<8x8xbf16>, vector<8x128xbf16>, vector<8x128xf32> -> vector<8x128xf32>
    %c0_3 = arith.constant 0 : index
    %c0_4 = arith.constant 0 : index
    %4 = vector.load %arg3[%c0_3, %c0_4] : memref<1x128xf32, #tpu.memory_space<vmem>>, vector<1x128xf32>
    %5 = vector.broadcast %4 : vector<1x128xf32> to vector<8x128xf32>
    %6 = arith.addf %3, %5 : vector<8x128xf32>
    %cst_5 = arith.constant 0.000000e+00 : f32
    %7 = vector.broadcast %cst_5 : f32 to vector<8x128xf32>
    %8 = arith.maximumf %6, %7 : vector<8x128xf32>
    %9 = arith.truncf %8 : vector<8x128xf32> to vector<8x128xbf16>
    %c0_6 = arith.constant 0 : index
    %c0_7 = arith.constant 0 : index
    %10 = vector.load %arg4[%c0_6, %c0_7] : memref<128x128xbf16, #tpu.memory_space<vmem>>, vector<128x128xbf16>
    %cst_8 = arith.constant dense<0.000000e+00> : vector<8x128xf32>
    %11 = tpu.matmul %9, %10, %cst_8 {dimension_numbers = #tpu.dot_dimension_numbers<[1], [0], [0], [1], [0, 0, 1, 1], [], []>} : vector<8x128xbf16>, vector<128x128xbf16>, vector<8x128xf32> -> vector<8x128xf32>
    %c0_9 = arith.constant 0 : index
    %c0_10 = arith.constant 0 : index
    %12 = vector.load %arg5[%c0_9, %c0_10] : memref<1x128xf32, #tpu.memory_space<vmem>>, vector<1x128xf32>
    %13 = vector.broadcast %12 : vector<1x128xf32> to vector<8x128xf32>
    %14 = arith.addf %11, %13 : vector<8x128xf32>
    %cst_11 = arith.constant 0.000000e+00 : f32
    %15 = vector.broadcast %cst_11 : f32 to vector<8x128xf32>
    %16 = arith.maximumf %14, %15 : vector<8x128xf32>
    %c0_12 = arith.constant 0 : index
    %c0_13 = arith.constant 0 : index
    %17 = vector.load %arg6[%c0_12, %c0_13] : memref<128x4xf32, #tpu.memory_space<vmem>>, vector<128x4xf32>
    %cst_14 = arith.constant dense<0.000000e+00> : vector<8x4xf32>
    %18 = tpu.matmul %16, %17, %cst_14 {dimension_numbers = #tpu.dot_dimension_numbers<[1], [0], [0], [1], [0, 0, 1, 1], [], []>} : vector<8x128xf32>, vector<128x4xf32>, vector<8x4xf32> -> vector<8x4xf32>
    %c0_15 = arith.constant 0 : index
    %c0_16 = arith.constant 0 : index
    %19 = vector.load %arg7[%c0_15, %c0_16] : memref<1x4xf32, #tpu.memory_space<vmem>>, vector<1x4xf32>
    %20 = vector.broadcast %19 : vector<1x4xf32> to vector<8x4xf32>
    %21 = arith.addf %18, %20 : vector<8x4xf32>
    %c0_17 = arith.constant 0 : index
    %c0_18 = arith.constant 0 : index
    %22 = vector.load %arg8[%c0_17, %c0_18] : memref<8x4xf32, #tpu.memory_space<vmem>>, vector<8x4xf32>
    tpu.vector_store %arg8[%c0_17, %c0_18], %21 {strides = array<i32>} : memref<8x4xf32, #tpu.memory_space<vmem>>, vector<8x4xf32>,
    return
  }
  func.func @transform_0(%arg0: i32) -> (i32, i32) {
    %c0_i32 = arith.constant 0 : i32
    %c0_i32_0 = arith.constant 0 : i32
    return %arg0, %c0_i32 : i32, i32
  }
  func.func @transform_1(%arg0: i32) -> (i32, i32) {
    %c0_i32 = arith.constant 0 : i32
    %c0_i32_0 = arith.constant 0 : i32
    %c0_i32_1 = arith.constant 0 : i32
    return %c0_i32, %c0_i32_0 : i32, i32
  }
  func.func @transform_2(%arg0: i32) -> (i32, i32) {
    %c0_i32 = arith.constant 0 : i32
    %c0_i32_0 = arith.constant 0 : i32
    %c0_i32_1 = arith.constant 0 : i32
    return %c0_i32, %c0_i32_0 : i32, i32
  }
  func.func @transform_3(%arg0: i32) -> (i32, i32) {
    %c0_i32 = arith.constant 0 : i32
    %c0_i32_0 = arith.constant 0 : i32
    %c0_i32_1 = arith.constant 0 : i32
    return %c0_i32, %c0_i32_0 : i32, i32
  }
  func.func @transform_4(%arg0: i32) -> (i32, i32) {
    %c0_i32 = arith.constant 0 : i32
    %c0_i32_0 = arith.constant 0 : i32
    %c0_i32_1 = arith.constant 0 : i32
    return %c0_i32, %c0_i32_0 : i32, i32
  }
  func.func @transform_5(%arg0: i32) -> (i32, i32) {
    %c0_i32 = arith.constant 0 : i32
    %c0_i32_0 = arith.constant 0 : i32
    %c0_i32_1 = arith.constant 0 : i32
    return %c0_i32, %c0_i32_0 : i32, i32
  }
  func.func @transform_6(%arg0: i32) -> (i32, i32) {
    %c0_i32 = arith.constant 0 : i32
    %c0_i32_0 = arith.constant 0 : i32
    %c0_i32_1 = arith.constant 0 : i32
    return %c0_i32, %c0_i32_0 : i32, i32
  }
  func.func @transform_7(%arg0: i32) -> (i32, i32) {
    %c0_i32 = arith.constant 0 : i32
    %c0_i32_0 = arith.constant 0 : i32
    return %arg0, %c0_i32 : i32, i32
  }
}

</mosaic_0001>

<bundles_post_ra>
// kernel: qnetwork_forward.1
= control target key start
LH: loop header
LB: loop body
LE: loop exit
PB: predicated region body
PF: predicated region fallthrough
CT: control target
= control target key end

     0   :  { %vm41_vm0 = vcmask 1043456   ;;  %v434_v0 = vmov 0.0   ;;  %vm435_vm1 = vmmov 0   ;;  %vm37_vm2 = vcmask 64512   ;;  %s567_s1 = inlined_call_operand.vmem [shape: bf16[8,128], index: 1, kind: input, shape index: {}]   ;;  %s568_s0 = inlined_call_operand.vmem [shape: f32[8,8], index: 0, kind: input, shape index: {}]   ;;  %s569_s3 = inlined_call_operand.vmem [shape: bf16[128,128], index: 3, kind: input, shape index: {}]   ;;  %s570_s5 = inlined_call_operand.vmem [shape: f32[128,4], index: 5, kind: input, shape index: {}]   ;;  %s571_s2 = inlined_call_operand.vmem [shape: f32[1,128], index: 2, kind: input, shape index: {}]   ;;  %s572_s4 = inlined_call_operand.vmem [shape: f32[1,128], index: 4, kind: input, shape index: {}]   ;;  %s573_s6 = inlined_call_operand.vmem [shape: f32[1,4], index: 6, kind: input, shape index: {}]   ;;  %s574_s7 = inlined_call_operand.vmem [shape: f32[8,4], index: 7, kind: output, shape index: {}]  }
   0x1   :  { %338 = vmatprep.subr.bf16.mxu0 %v434_v0  ;;  %v29_v1 = vld [vmem:[%s567_s1] sm:$0xf]  ;;  %340 = vmatprep.mubr.msk.bf16.mxu0 %vm435_vm1, %v434_v0  ;;  %v427_v6 = vld [vmem:[%s569_s3 + $0x8] sm:$0xff]   ;;  %v428_v7 = vld [vmem:[%s569_s3 + $0x10] sm:$0xff]   ;;  %v436_v13 = vmov 0.0|0.0   ;;  %vm292_vm3 = vcmask 31744  }
   0x2   :  { %v27_v2 = vld [vmem:[%s568_s0] sm:$0xff]  ;;  %v43_v3 = vsel %vm41_vm0, %v29_v1, 0  ;;  %344 = vmatprep.subr.bf16.mxu1 %v434_v0  ;;  %360 = vmatprep.mubr.msk.bf16.mxu1 %vm435_vm1, %v434_v0  ;;  %v429_v8 = vld [vmem:[%s569_s3 + $0x18] sm:$0xff]   ;;  %v431_v10 = vld [vmem:[%s569_s3 + $0x28] sm:$0xff]  }
   0x3   :  { %v28_v4 = vpack.c.bf16 %v27_v2, %v27_v2  ;;  %v426_v5 = vld [vmem:[%s569_s3] sm:$0xff]   ;;  %339 = vmatpush3.bf16.msra.mxu0 %v43_v3  ;;  %v432_v11 = vld [vmem:[%s569_s3 + $0x30] sm:$0xff]   ;;  %v433_v12 = vld [vmem:[%s569_s3 + $0x38] sm:$0xff]  }
   0x4   :  { %345 = vmatpush3.bf16.msra.mxu1 %v426_v5  ;;  %v430_v9 = vld [vmem:[%s569_s3 + $0x20] sm:$0xff]   ;;  %399 = vmatprep.subr.bf16.mxu0 %v436_v13  ;;  %v200_v15 = vld [vmem:[%s570_s5 + $0x8] sm:$0xff]  ;;  %v201_v16 = vld [vmem:[%s570_s5 + $0x10] sm:$0xff] }
   0x5   :  { %346 = vmatprep.subr.bf16.mxu1 %v434_v0  ;;  %v199_v14 = vld [vmem:[%s570_s5] sm:$0xff]  ;;  %v202_v18 = vld [vmem:[%s570_s5 + $0x18] sm:$0xff]  ;;  %v204_v21 = vld [vmem:[%s570_s5 + $0x28] sm:$0xff] }
   0x6   :  { %341 = vmatmul.mubr.msk.bf16.vlgmr.msra.gmra.mrb[0].mxu0 %vm37_vm2, %v28_v4  ;;  %v400_v17 = vpack.c.bf16 %v200_v15, %v199_v14  ;;  %v403_v19 = vpack.c.bf16 %v202_v18, %v201_v16  ;;  %v203_v20 = vld [vmem:[%s570_s5 + $0x20] sm:$0xff]  ;;  %v205_v23 = vld [vmem:[%s570_s5 + $0x30] sm:$0xff]  ;;  %v206_v24 = vld [vmem:[%s570_s5 + $0x38] sm:$0xff] }
   0x7   :  { %396 = vmatprep.mubr.msk.f32.mxu0 %vm435_vm1, %v434_v0  ;;  %v406_v22 = vpack.c.bf16 %v204_v21, %v203_v20  ;;  %v409_v25 = vpack.c.bf16 %v206_v24, %v205_v23  ;;  %v207_v26 = vld [vmem:[%s570_s5 + $0x40] sm:$0xff]  ;;  %v208_v27 = vld [vmem:[%s570_s5 + $0x48] sm:$0xff]  ;;  %v209_v29 = vld [vmem:[%s570_s5 + $0x50] sm:$0xff] }
   0x8   :  { %347 = vmatpush3.bf16.msra.mxu1 %v427_v6  ;;  %401 = vmatpush3.bf16.msra.mxu0 %v400_v17  ;;  %v412_v28 = vpack.c.bf16 %v208_v27, %v207_v26  ;;  %v210_v30 = vld [vmem:[%s570_s5 + $0x58] sm:$0xff]  ;;  %v211_v32 = vld [vmem:[%s570_s5 + $0x60] sm:$0xff]  ;;  %v212_v33 = vld [vmem:[%s570_s5 + $0x68] sm:$0xff] }
   0x9   :  { %348 = vmatprep.subr.bf16.mxu1 %v434_v0  ;;  %402 = vmatprep.subr.bf16.mxu0 %v436_v13  ;;  %v415_v31 = vpack.c.bf16 %v210_v30, %v209_v29  ;;  %v418_v34 = vpack.c.bf16 %v212_v33, %v211_v32  ;;  %v298_v35 = vld [vmem:[%s571_s2] ss:$0 sm:$0xff]  ;;  %v213_v43 = vld [vmem:[%s570_s5 + $0x70] sm:$0xff]  ;;  %v214_v44 = vld [vmem:[%s570_s5 + $0x78] sm:$0xff] }
   0xa   :  { %v421_v45 = vpack.c.bf16 %v214_v44, %v213_v43  ;;  %v300_v46 = vld [vmem:[%s572_s4] ss:$0 sm:$0xff] }
   0xb   :  { %v309_v53 = vld [vmem:[%s573_s6] ss:$0 sm:$0xff] }
   0xc   :  { %349 = vmatpush3.bf16.msra.mxu1 %v428_v7  ;;  %404 = vmatpush3.bf16.msra.mxu0 %v403_v19 }
   0xd   :  { %350 = vmatprep.subr.bf16.mxu1 %v434_v0  ;;  %405 = vmatprep.subr.bf16.mxu0 %v436_v13 }
  0x10   :  { %351 = vmatpush3.bf16.msra.mxu1 %v429_v8  ;;  %407 = vmatpush3.bf16.msra.mxu0 %v406_v22 }
  0x11   :  { %352 = vmatprep.subr.bf16.mxu1 %v434_v0  ;;  %408 = vmatprep.subr.bf16.mxu0 %v436_v13 }
  0x14   :  { %353 = vmatpush3.bf16.msra.mxu1 %v430_v9  ;;  %410 = vmatpush3.bf16.msra.mxu0 %v409_v25 }
  0x15   :  { %354 = vmatprep.subr.bf16.mxu1 %v434_v0  ;;  %411 = vmatprep.subr.bf16.mxu0 %v436_v13 }
  0x18   :  { %355 = vmatpush3.bf16.msra.mxu1 %v431_v10  ;;  %413 = vmatpush3.bf16.msra.mxu0 %v412_v28 }
  0x19   :  { %356 = vmatprep.subr.bf16.mxu1 %v434_v0  ;;  %414 = vmatprep.subr.bf16.mxu0 %v436_v13 }
  0x1c   :  { %357 = vmatpush3.bf16.msra.mxu1 %v432_v11  ;;  %416 = vmatpush3.bf16.msra.mxu0 %v415_v31 }
  0x1d   :  { %358 = vmatprep.subr.bf16.mxu1 %v434_v0  ;;  %417 = vmatprep.subr.bf16.mxu0 %v436_v13 }
  0x20   :  { %359 = vmatpush3.bf16.msra.mxu1 %v433_v12  ;;  %419 = vmatpush3.bf16.msra.mxu0 %v418_v34 }
  0x21   :  { %420 = vmatprep.subr.bf16.mxu0 %v436_v13 }
  0x24   :  { %422 = vmatpush3.bf16.msra.mxu0 %v421_v45 }
  0xd9   :  { %v79_v36 = vpop.f32.mrb[0].mxu0 }
  0xda   :  { %v80_v37 = vadd.f32 %v298_v35, %v79_v36  ;;  %v342_v38 = vpop.f32.mrb[1].mxu0 }
  0xdb   :  { %v82_v39 = vpop.f32.mrb[2].mxu0 }
  0xdc   :  { %v85_v40 = vmax.f32 %v80_v37, 0.0  ;;  %v343_v41 = vpop.f32.mrb[3].mxu0 }
  0xde   :  { %v86_v42 = vpack.c.bf16 %v85_v40, %v85_v40 }
  0xe0   :  { %361 = vmatmul.mubr.bf16.vlgmr.msra.gmra.mrb[0].mxu1 %v86_v42 }
 0x1b3   :  { %v192_v47 = vpop.f32.mrb[0].mxu1 }
 0x1b4   :  { %v193_v48 = vadd.f32 %v300_v46, %v192_v47  ;;  %v362_v49 = vpop.f32.mrb[1].mxu1 }
 0x1b5   :  { %v195_v50 = vpop.f32.mrb[2].mxu1 }
 0x1b6   :  { %v198_v51 = vmax.f32 %v193_v48, 0.0  ;;  %v363_v52 = vpop.f32.mrb[3].mxu1 }
 0x1b8   :  { %397 = vmatmul.mubr.f32.vlgmr.msra.gmra.mrb[4].mxu0 %v198_v51 }
 0x28b   :  { %v288_v54 = vpop.f32.mrb[4].mxu0 }
 0x28c   :  { %v289_v55 = vadd.f32 %v309_v53, %v288_v54  ;;  %v398_v56 = vpop.f32.mrb[5].mxu0 }
 0x28e   :  { %293 = vst.msk [vmem:[%s574_s7] sm:$0xff] %vm292_vm3, %v289_v55 }

</bundles_post_ra>
